<compile_context>
chip_gen: v7x
topology: tpu7x:2x2x1
jax: 0.10.0
libtpu: 0.0.40
codegen_flags: <defaults>
</compile_context>

<pallas_src>
import jax
import jax.numpy as jnp
from jax import lax
from jax.experimental import pallas as pl
from jax.experimental.pallas import tpu as pltpu


_ROW_ALIGN = 8       # sublane-tile alignment for per-level row offsets
_TILE_M_PREF = 256   # preferred M tile (rows of P_all), sized for v7x VMEM
_TILE_K_PREF = 512   # preferred K tile (fine-node axis), multiple of 128


def _round_up(v, m):
    return ((v + m - 1) // m) * m


# ---------------------------------------------------------------------------
# Kernel 1 (run once per graph, cached): build the fused dense pooling matrix
#   P_all[r, s] = sum_{e : dst_pad[e]==r and src[e]==s} w[e]
# ---------------------------------------------------------------------------
def _build_p_kernel(src_ref, dst_ref, w_ref, p_ref):
    e = src_ref.shape[0]
    n_out, n_in = p_ref.shape

    # Weighted destination selector, built directly in [n_out, E] orientation
    # (edge axis lane-dense) with the edge weight folded into the select.
    row_iota = lax.broadcasted_iota(jnp.int32, (n_out, e), 0)
    lhs = jnp.where(dst_ref[...] == row_iota, w_ref[...], 0.0)       # [n_out, E]

    # 0/1 source selector: [E, n_in].
    col_iota = lax.broadcasted_iota(jnp.int32, (e, n_in), 1)
    rhs = jnp.where(src_ref[...] == col_iota, 1.0, 0.0)              # [E, n_in]

    p_ref[...] = jnp.dot(lhs, rhs,
                         preferred_element_type=jnp.float32,
                         precision=lax.Precision.HIGHEST)


# ---------------------------------------------------------------------------
# Kernel 2 (per forward): tiled P_all @ x with f32 accumulator (P3 pattern).
# ---------------------------------------------------------------------------
def _pool_matmul_kernel(p_ref, x_ref, out_ref, acc_ref):
    @pl.when(pl.program_id(1) == 0)
    def _init():
        acc_ref[...] = jnp.zeros_like(acc_ref)

    # Cast x inside the kernel (VPU filler under the MXU, no wrapper-side op).
    acc_ref[...] += jnp.dot(p_ref[...],
                            x_ref[...].astype(jnp.float32),
                            preferred_element_type=jnp.float32,
                            precision=lax.Precision.HIGHEST)

    @pl.when(pl.program_id(1) == pl.num_programs(1) - 1)
    def _finalize():
        out_ref[...] = acc_ref[...].astype(out_ref.dtype)


# ---------------------------------------------------------------------------
# Graph-static build (cached per graph).
# ---------------------------------------------------------------------------
def build_fused_pooling_matrix(pools, n_in):
    """Concatenate all pooling levels (dst offset by the running, 8-aligned
    coarse-row count) into one dense P_all[m_pad, n_in_pad]."""
    srcs, dsts, ws, row_slices = [], [], [], []
    offset = 0
    for p in pools:
        ei = jnp.asarray(p["edge_index"], dtype=jnp.int32)
        ea = jnp.asarray(p["edge_attr"], dtype=jnp.float32)
        n_coarse = int(p["n_coarse"])
        srcs.append(ei[0])
        dsts.append(ei[1] + offset)
        ws.append(ea)
        row_slices.append((offset, n_coarse))
        offset += _round_up(n_coarse, _ROW_ALIGN)   # 8-aligned level offsets
    m_raw = offset

    # M tile: at least two tiles where possible so both v7x TCs get work.
    if m_raw >= 2 * _ROW_ALIGN:
        tile_m = min(_TILE_M_PREF, _round_up((m_raw + 1) // 2, _ROW_ALIGN))
    else:
        tile_m = _ROW_ALIGN
    m_pad = _round_up(m_raw, tile_m)

    # K tile: full when small (no 128 constraint since block == full dim),
    # 512 (lane-tile multiple) with zero-padding of x rows when large.
    if n_in <= _TILE_K_PREF:
        tile_k, n_in_pad = n_in, n_in
    else:
        tile_k = _TILE_K_PREF
        n_in_pad = _round_up(n_in, tile_k)

    src = jnp.concatenate(srcs)
    dst = jnp.concatenate(dsts)
    w = jnp.concatenate(ws)
    e_total = int(src.shape[0])

    src_col = src.reshape(e_total, 1)   # [E, 1]
    dst_row = dst.reshape(1, e_total)   # [1, E] (lane-dense)
    w_row = w.reshape(1, e_total)       # [1, E]

    p_all = pl.pallas_call(
        _build_p_kernel,
        out_shape=jax.ShapeDtypeStruct((m_pad, n_in_pad), jnp.float32),
        grid=(1,),
        in_specs=[
            pl.BlockSpec((e_total, 1), lambda i: (0, 0)),
            pl.BlockSpec((1, e_total), lambda i: (0, 0)),
            pl.BlockSpec((1, e_total), lambda i: (0, 0)),
        ],
        out_specs=pl.BlockSpec((m_pad, n_in_pad), lambda i: (0, 0)),
        compiler_params=pltpu.CompilerParams(
            dimension_semantics=("arbitrary",),
            vmem_limit_bytes=32 * 1024 * 1024),
    )(src_col, dst_row, w_row)

    tiling = dict(tile_m=tile_m, tile_k=tile_k, n_in_pad=n_in_pad)
    return p_all, tuple(row_slices), tiling


# ---------------------------------------------------------------------------
# Per-forward tiled matmul: out_all = P_all @ x (one launch for all levels).
# ---------------------------------------------------------------------------
def fused_pooling_apply(p_all, x, *, tile_m, tile_k, n_in_pad):
    m_pad, k_pad = p_all.shape
    n, c = x.shape
    out_dtype = x.dtype
    if n_in_pad != n:
        x = jnp.pad(x, ((0, n_in_pad - n), (0, 0)))

    grid = (m_pad // tile_m, k_pad // tile_k)

    flops = 2 * m_pad * k_pad * c
    bytes_accessed = (m_pad * k_pad * 4
                      + k_pad * c * x.dtype.itemsize
                      + m_pad * c * jnp.dtype(out_dtype).itemsize)
    vmem_need = (2 * (tile_m * tile_k * 4 + tile_k * c * 4 + tile_m * c * 4)
                 + tile_m * c * 4)
    vmem_limit = int(min(max(4 * vmem_need, 16 << 20), 32 << 20))

    return pl.pallas_call(
        _pool_matmul_kernel,
        out_shape=jax.ShapeDtypeStruct((m_pad, c), out_dtype),
        grid=grid,
        in_specs=[
            pl.BlockSpec((tile_m, tile_k), lambda i, k: (i, k)),
            pl.BlockSpec((tile_k, c), lambda i, k: (k, 0)),
        ],
        out_specs=pl.BlockSpec((tile_m, c), lambda i, k: (i, 0)),
        scratch_shapes=[pltpu.VMEM((tile_m, c), jnp.float32)],
        compiler_params=pltpu.CompilerParams(
            dimension_semantics=("parallel", "arbitrary"),
            vmem_limit_bytes=vmem_limit),
        cost_estimate=pl.CostEstimate(flops=flops, transcendentals=0,
                                      bytes_accessed=bytes_accessed),
    )(p_all, x)


# ---------------------------------------------------------------------------
# Module (structural parity with the PyTorch model; only convN_2 is exercised)
# ---------------------------------------------------------------------------
class _ConvBlock1:
    def __init__(self, in_channels, out_channels, GNNData=None):
        del in_channels, out_channels, GNNData

    def __call__(self, x, pointTypes, graphData, GNNDataForward):
        return x


class _ConvBlock2:
    """CustomPoolingAdd block (weighted scatter-add); no params on exec path."""

    def __init__(self, in_channels, out_channels, GNNData=None):
        del in_channels, out_channels, GNNData
        self._cache = {}

    def __call__(self, x, graphData, graphPoolData, poolDataForward):
        del graphData, poolDataForward
        key = (int(x.shape[0]), id(graphPoolData))
        if key not in self._cache:
            built = build_fused_pooling_matrix([graphPoolData], int(x.shape[0]))
            self._cache[key] = (graphPoolData,) + built   # strong ref keeps id valid
        _, p_all, row_slices, tiling = self._cache[key]
        out = fused_pooling_apply(p_all, x, **tiling)
        off, n = row_slices[0]
        return out[off:off + n]


class _PoolStub:
    """Unused blocks (3..8) kept only for structural parity."""

    def __init__(self, in_channels, out_channels, GNNData=None):
        del in_channels, out_channels, GNNData

    def __call__(self, x, *args):
        return x


class GraphUNetSimpleInstanceNorm4layers_raw:

    def __init__(self, GNNData=None):
        self.convN_1 = _ConvBlock1(1, 16, GNNData)
        self.convN_2 = _ConvBlock2(16, 16, GNNData)
        self.convN_3 = _PoolStub(16, 16, GNNData)
        self.convN_4 = _PoolStub(16, 32, GNNData)
        self.convN_5 = _PoolStub(32, 32, GNNData)
        self.convN_5_5 = _PoolStub(32, 32, GNNData)
        self.convN_6 = _PoolStub(32, 32, GNNData)
        self.convN_7 = _PoolStub(32, 32, GNNData)
        self.convN_8 = _PoolStub(32, 32, GNNData)
        self._cache = {}   # per-(graph, n_in) fused pooling matrix + jitted apply

    def _get_apply(self, pools, n_in):
        key = (n_in,) + tuple(id(p) for p in pools)
        entry = self._cache.get(key)
        if entry is None:
            p_all, row_slices, tiling = build_fused_pooling_matrix(pools, n_in)

            @jax.jit
            def apply_fn(p_all_arg, x):
                # One kernel launch + three tile-aligned slices, all jit-fused.
                out_all = fused_pooling_apply(p_all_arg, x, **tiling)
                return tuple(out_all[off:off + n] for (off, n) in row_slices)

            # Hold strong refs to the pooling dicts so their CPython ids
            # cannot be recycled while this cache entry is alive.
            entry = (tuple(pools), p_all, apply_fn)
            self._cache[key] = entry
        return entry

    def forward(self, x, graphData, graphPoolData, GNNDataForward,
                poolDataForward, pointTypes):
        del graphData, GNNDataForward, poolDataForward, pointTypes
        pools = [graphPoolData[i]["pooling"] for i in range(3)]
        _, p_all, apply_fn = self._get_apply(pools, int(x.shape[0]))
        x2, x3, x4 = apply_fn(p_all, x)
        return (x, x2, x3, x4)


if __name__ == "__main__":
    key = jax.random.PRNGKey(0)
    N, C = 64, 16                      # fine nodes, feature channels
    levels = [32, 16, 8]               # coarse node counts for the 3 levels

    kx, k0, k1, k2 = jax.random.split(key, 4)
    x = jax.random.normal(kx, (N, C), dtype=jnp.float32)

    graphPoolData, poolDataForward = [], []
    for lvl_key, n_coarse in zip((k0, k1, k2), levels):
        ratio = N // n_coarse
        src = jnp.arange(N, dtype=jnp.int32)
        dst = src // ratio
        edge_index = jnp.stack([src, dst], axis=0)                    # [2, E]
        edge_attr = jax.random.uniform(lvl_key, (N,), dtype=jnp.float32)
        graphPoolData.append({"pooling": {"edge_index": edge_index,
                                          "edge_attr": edge_attr,
                                          "n_coarse": n_coarse}})
        poolDataForward.append({"pooling": None})

    model = GraphUNetSimpleInstanceNorm4layers_raw(None)
    out = model.forward(x, [None, None, None, None], graphPoolData,
                        None, poolDataForward, None)
    out = jax.block_until_ready(out)

    # pure-JAX reference: weighted scatter-add per level
    for i, n_coarse in enumerate(levels):
        ei = graphPoolData[i]["pooling"]["edge_index"]
        ea = graphPoolData[i]["pooling"]["edge_attr"]
        ref = jax.ops.segment_sum(x[ei[0]] * ea[:, None], ei[1],
                                  num_segments=n_coarse)
        assert out[i + 1].shape == (n_coarse, C), out[i + 1].shape
        assert jnp.allclose(out[i + 1], ref, atol=1e-4, rtol=1e-4), (
            f"level {i} mismatch: {jnp.max(jnp.abs(out[i + 1] - ref))}")
    assert jnp.allclose(out[0], x)

    # second forward hits the cached pooling matrix + jitted apply
    out2 = jax.block_until_ready(
        model.forward(x, [None] * 4, graphPoolData, None, poolDataForward, None))
    assert all(jnp.allclose(a, b) for a, b in zip(out, out2))

    print("KERNEL_OK")
</pallas_src>

<mosaic_0001>
module attributes {stable_mosaic.version = 11 : i64} {
  func.func @_build_p_kernel(%arg0: i32, %arg1: memref<192x1xi32, #tpu.memory_space<vmem>>, %arg2: memref<1x192xi32, #tpu.memory_space<vmem>>, %arg3: memref<1x192xf32, #tpu.memory_space<vmem>>, %arg4: memref<64x64xf32, #tpu.memory_space<vmem>>) attributes {dimension_semantics = [#tpu.dimension_semantics<arbitrary>], iteration_bounds = array<i64: 1>, scalar_prefetch = 0 : i64, scratch_operands = 0 : i64, tpu.core_type = #tpu.core_type<tc>, window_params = [{pipeline_mode = #tpu.pipeline_mode<synchronous>, transform_indices = @transform_0, window_bounds = array<i64: 192, 1>}, {pipeline_mode = #tpu.pipeline_mode<synchronous>, transform_indices = @transform_1, window_bounds = array<i64: 1, 192>}, {pipeline_mode = #tpu.pipeline_mode<synchronous>, transform_indices = @transform_2, window_bounds = array<i64: 1, 192>}, {pipeline_mode = #tpu.pipeline_mode<synchronous>, transform_indices = @transform_3, window_bounds = array<i64: 64, 64>}]} {
    %0 = tpu.iota {dimensions = array<i32: 0>} : vector<64x192xi32>
    %c0 = arith.constant 0 : index
    %c0_0 = arith.constant 0 : index
    %1 = vector.load %arg2[%c0, %c0_0] : memref<1x192xi32, #tpu.memory_space<vmem>>, vector<1x192xi32>
    %2 = vector.broadcast %1 : vector<1x192xi32> to vector<64x192xi32>
    %3 = arith.cmpi eq, %2, %0 : vector<64x192xi32>
    %c0_1 = arith.constant 0 : index
    %c0_2 = arith.constant 0 : index
    %4 = vector.load %arg3[%c0_1, %c0_2] : memref<1x192xf32, #tpu.memory_space<vmem>>, vector<1x192xf32>
    %cst = arith.constant 0.000000e+00 : f32
    %5 = vector.shape_cast %4 : vector<1x192xf32> to vector<1x192xf32>
    %6 = vector.broadcast %5 : vector<1x192xf32> to vector<64x192xf32>
    %7 = vector.broadcast %cst : f32 to vector<64x192xf32>
    %8 = arith.select %3, %6, %7 : vector<64x192xi1>, vector<64x192xf32>
    %9 = tpu.iota {dimensions = array<i32: 1>} : vector<192x64xi32>
    %c0_3 = arith.constant 0 : index
    %c0_4 = arith.constant 0 : index
    %10 = vector.load %arg1[%c0_3, %c0_4] : memref<192x1xi32, #tpu.memory_space<vmem>>, vector<192x1xi32>
    %11 = vector.broadcast %10 : vector<192x1xi32> to vector<192x64xi32>
    %12 = arith.cmpi eq, %11, %9 : vector<192x64xi32>
    %cst_5 = arith.constant 1.000000e+00 : f32
    %cst_6 = arith.constant 0.000000e+00 : f32
    %13 = vector.broadcast %cst_5 : f32 to vector<192x64xf32>
    %14 = vector.broadcast %cst_6 : f32 to vector<192x64xf32>
    %15 = arith.select %12, %13, %14 : vector<192x64xi1>, vector<192x64xf32>
    %cst_7 = arith.constant dense<0.000000e+00> : vector<64x64xf32>
    %16 = tpu.matmul %8, %15, %cst_7 {dimension_numbers = #tpu.dot_dimension_numbers<[1], [0], [0], [1], [0, 0, 1, 1], [], []>, precision = #tpu.contract_precision<fp32>} : vector<64x192xf32>, vector<192x64xf32>, vector<64x64xf32> -> vector<64x64xf32>
    %c0_8 = arith.constant 0 : index
    %c0_9 = arith.constant 0 : index
    %17 = vector.load %arg4[%c0_8, %c0_9] : memref<64x64xf32, #tpu.memory_space<vmem>>, vector<64x64xf32>
    tpu.vector_store %arg4[%c0_8, %c0_9], %16 {strides = array<i32>} : memref<64x64xf32, #tpu.memory_space<vmem>>, vector<64x64xf32>,
    return
  }
  func.func @transform_0(%arg0: i32) -> (i32, i32) {
    %c0_i32 = arith.constant 0 : i32
    %c0_i32_0 = arith.constant 0 : i32
    %c0_i32_1 = arith.constant 0 : i32
    return %c0_i32, %c0_i32_0 : i32, i32
  }
  func.func @transform_1(%arg0: i32) -> (i32, i32) {
    %c0_i32 = arith.constant 0 : i32
    %c0_i32_0 = arith.constant 0 : i32
    %c0_i32_1 = arith.constant 0 : i32
    return %c0_i32, %c0_i32_0 : i32, i32
  }
  func.func @transform_2(%arg0: i32) -> (i32, i32) {
    %c0_i32 = arith.constant 0 : i32
    %c0_i32_0 = arith.constant 0 : i32
    %c0_i32_1 = arith.constant 0 : i32
    return %c0_i32, %c0_i32_0 : i32, i32
  }
  func.func @transform_3(%arg0: i32) -> (i32, i32) {
    %c0_i32 = arith.constant 0 : i32
    %c0_i32_0 = arith.constant 0 : i32
    %c0_i32_1 = arith.constant 0 : i32
    return %c0_i32, %c0_i32_0 : i32, i32
  }
}

</mosaic_0001>

<bundles_post_ra>
// kernel: tpu_custom_call.1
= control target key start
LH: loop header
LB: loop body
LE: loop exit
PB: predicated region body
PF: predicated region fallthrough
CT: control target
= control target key end

     0   :  { %v1671_v2 = vmov 0   ;;  %v2862_v7 = vmov 0.0|0.0   ;;  %s2836_s0 = inlined_call_operand.vmem [shape: s32[192,1], index: 0, kind: input, shape index: {}]   ;;  %s2837_s1 = inlined_call_operand.vmem [shape: s32[1,192], index: 1, kind: input, shape index: {}]   ;;  %s2838_s2 = inlined_call_operand.vmem [shape: f32[1,192], index: 2, kind: input, shape index: {}]   ;;  %s2839_s3 = inlined_call_operand.hbm [shape: f32[64,64], index: 3, kind: output, shape index: {}]  }
   0x1   :  { %v81_v0 = vld [vmem:[%s2836_s0 + $0x10] sm:$0xff]  ;;  %v79_v1 = vld [vmem:[%s2836_s0] sm:$0xff]  ;;  %1646 = vset.pattern.permute.xlu1 %v1671_v2  ;;  %1645 = vset.pattern.permute.xlu0 %v1671_v2  ;;  %v82_v3 = vld [vmem:[%s2836_s0 + $0x18] sm:$0xff] }
   0x2   :  { %110 = vperm.xlu1 %1646, %v81_v0   ;;  %104 = vperm.xlu0 %1645, %v79_v1   ;;  %v80_v4 = vld [vmem:[%s2836_s0 + $0x8] sm:$0xff]  ;;  %v83_v6 = vld [vmem:[%s2836_s0 + $0x20] sm:$0xff] }
   0x3   :  { %v84_v5 = vld [vmem:[%s2836_s0 + $0x28] sm:$0xff]  ;;  %1350 = vmatprep.subr.bf16.mxu1 %v2862_v7  ;;  %1458 = vmatprep.subr.bf16.mxu0 %v2862_v7 }
   0x6   :  { %113 = vperm.xlu1 %1646, %v82_v3   ;;  %107 = vperm.xlu0 %1645, %v80_v4  }
   0x7   :  { %8 = vsyncpa [#allocation3], 0  ;;  %v86_v8 = vld [vmem:[%s2836_s0 + $0x38] sm:$0xff]  ;;  %v85_v9 = vld [vmem:[%s2836_s0 + $0x30] sm:$0xff]  ;;  %v15_v22 = vlaneseq  ;;  %vm223_vm1 = vcmask 523264  }
   0x8   :  { %v88_v10 = vld [vmem:[%s2836_s0 + $0x48] sm:$0xff]  ;;  %v87_v11 = vld [vmem:[%s2836_s0 + $0x40] sm:$0xff]  ;;  %v90_v12 = vld [vmem:[%s2836_s0 + $0x58] sm:$0xff] }
   0x9   :  { %v89_v13 = vld [vmem:[%s2836_s0 + $0x50] sm:$0xff]  ;;  %v92_v14 = vld [vmem:[%s2836_s0 + $0x68] sm:$0xff]  ;;  %v91_v15 = vld [vmem:[%s2836_s0 + $0x60] sm:$0xff]  ;;  %v16_v23 = vshrl.u32 %v15_v22, 7  ;;  %v1822_v3 = vand.u32 127, %v15_v22 }
   0xa   :  { %119 = vperm.xlu1 %1646, %v84_v5   ;;  %116 = vperm.xlu0 %1645, %v83_v6   ;;  %v94_v16 = vld [vmem:[%s2836_s0 + $0x78] sm:$0xff]  ;;  %v93_v17 = vld [vmem:[%s2836_s0 + $0x70] sm:$0xff]  ;;  %v96_v18 = vld [vmem:[%s2836_s0 + $0x88] sm:$0xff]  ;;  %v2927_v6 = vmov 0 }
   0xb   :  { %v95_v19 = vld [vmem:[%s2836_s0 + $0x80] sm:$0xff]  ;;  %v98_v20 = vld [vmem:[%s2836_s0 + $0x98] sm:$0xff]  ;;  %v97_v21 = vld [vmem:[%s2836_s0 + $0x90] sm:$0xff]  ;;  %v31_v26 = vsub.s32 1, %v16_v23  ;;  %v27_v28 = vsub.s32 0, %v16_v23  ;;  %v17_v44 = vadd.s32 8, %v16_v23 }
   0xc   :  { %v100_v24 = vld [vmem:[%s2836_s0 + $0xa8] sm:$0xff]  ;;  %v99_v25 = vld [vmem:[%s2836_s0 + $0xa0] sm:$0xff]  ;;  %v102_v31 = vld [vmem:[%s2836_s0 + $0xb8] sm:$0xff]  ;;  %v18_v46 = vadd.s32 16, %v16_v23  ;;  %v19_v49 = vadd.s32 24, %v16_v23  ;;  %v20_v53 = vadd.s32 32, %v16_v23 }
   0xd   :  { %v24_v27 = vld [vmem:[%s2837_s1] sm:$0x3]  ;;  %v101_v32 = vld [vmem:[%s2836_s0 + $0xb0] sm:$0xff]  ;;  %v21_v56 = vadd.s32 40, %v16_v23  ;;  %v22_v57 = vadd.s32 48, %v16_v23  ;;  %v23_v62 = vadd.s32 56, %v16_v23 }
   0xe   :  { %125 = vperm.xlu1 %1646, %v86_v8   ;;  %122 = vperm.xlu0 %1645, %v85_v9   ;;  %v32_v29 = vrot.slane %v24_v27, %v31_v26  ;;  %v49_v30 = vld [vmem:[%s2838_s2] sm:$0x3]  ;;  %v28_v34 = vrot.slane %v24_v27, %v27_v28  ;;  %v2860_v8 = vmov 1.0|1.0   ;;  %s1675_s0 = smov [#allocation2]  }
   0xf   :  { %v58_v33 = vrot.slane %v49_v30, %v31_v26  ;;  %v54_v35 = vrot.slane %v49_v30, %v27_v28  ;;  %v2942_v26 = vmov 0  ;;  %s1267_s1 = sshll.u32 %s1675_s0, 4  ;;  %s1268_s1 = int_to_ptr.vmem [resolvable:$true] %s1267_s1 }
  0x10   :  { %vm34_vm0 = vcmp.eq.s32.totalorder %v32_v29, %v16_v23  ;;  %vm33_vm2 = vcmp.eq.s32.totalorder %v28_v34, %v16_v23  ;;  %vm36_vm3 = vcmp.eq.s32.totalorder %v32_v29, %v17_v44  ;;  %vm35_vm4 = vcmp.eq.s32.totalorder %v28_v34, %v17_v44  ;;  %s1647_s2 = scalar_lea.vmem %s1268_s1, 1024  ;;  %p1652_p1 = scmp.lt.s32.totalorder %s1268_s1, %s1268_s1 }
  0x11   :  { %v62_v36 = vsel %vm34_vm0, %v58_v33, 0.0  ;;  %v1782_v39 = vsel %vm33_vm2, %v54_v35, 0.0  ;;  %v1789_v45 = vsel %vm36_vm3, %v58_v33, 0.0  ;;  %v1791_v47 = vsel %vm35_vm4, %v54_v35, 0.0  ;;  %p1648_p0 = scmp.ne.s32.totalorder %s1268_s1, %s1647_s2  ;;  %p1653_p2 = scmp.lt.s32.totalorder %s1647_s2, %s1647_s2 }
  0x12   :  { %131 = vperm.xlu1 %1646, %v88_v10   ;;  %128 = vperm.xlu0 %1645, %v87_v11   ;;  %v225_v37 = vsel %vm223_vm1, %v62_v36, 0  ;;  %vm38_vm5 = vcmp.eq.s32.totalorder %v32_v29, %v18_v46  ;;  %vm37_vm6 = vcmp.eq.s32.totalorder %v28_v34, %v18_v46  ;;  %vm40_vm7 = vcmp.eq.s32.totalorder %v32_v29, %v19_v49 }
  0x13   :  { %v1780_v38 = vand.u32 4294901760, %v225_v37  ;;  %v1793_v48 = vsel %vm38_vm5, %v58_v33, 0.0  ;;  %v1795_v50 = vsel %vm37_vm6, %v54_v35, 0.0  ;;  %v1797_v51 = vsel %vm40_vm7, %v58_v33, 0.0  ;;  %p1654_p3 = por %p1653_p2, %p1652_p1 }
  0x14   :  { %vm39_vm8 = vcmp.eq.s32.totalorder %v28_v34, %v19_v49  ;;  %vm42_vm9 = vcmp.eq.s32.totalorder %v32_v29, %v20_v53  ;;  %vm41_vm10 = vcmp.eq.s32.totalorder %v28_v34, %v20_v53  ;;  %vm44_vm11 = vcmp.eq.s32.totalorder %v32_v29, %v21_v56 }
  0x15   :  { %2925 = vst [vmem:[#allocation5_spill] sm:$0xff] %v1780_v38  ;;  %v1785_v40 = vsub.f32 %v225_v37, %v1780_v38  ;;  %v1799_v52 = vsel %vm39_vm8, %v54_v35, 0.0  ;;  %v1801_v54 = vsel %vm42_vm9, %v58_v33, 0.0  ;;  %v1803_v55 = vsel %vm41_vm10, %v54_v35, 0.0  ;;  %p1655_p4 = pnand %p1654_p3, %p1648_p0 }
  0x16   :  { %137 = vperm.xlu1 %1646, %v90_v12   ;;  %134 = vperm.xlu0 %1645, %v89_v13   ;;  %vm43_vm12 = vcmp.eq.s32.totalorder %v28_v34, %v21_v56  ;;  %v1805_v58 = vsel %vm44_vm11, %v58_v33, 0.0  ;;  %vm46_vm13 = vcmp.eq.s32.totalorder %v32_v29, %v22_v57  ;;  %vm45_vm14 = vcmp.eq.s32.totalorder %v28_v34, %v22_v57 }
  0x17   :  { %2926 = vst [vmem:[#allocation6_spill] sm:$0xff] %v1785_v40  ;;  %v314_v41 = vand.u32 4294901760, %v1785_v40  ;;  %v1807_v59 = vsel %vm43_vm12, %v54_v35, 0.0  ;;  %v1809_v60 = vsel %vm46_vm13, %v58_v33, 0.0  ;;  %v1811_v61 = vsel %vm45_vm14, %v54_v35, 0.0 }
  0x18   :  { %vm48_vm15 = vcmp.eq.s32.totalorder %v32_v29, %v23_v62  ;;  %vm47_vm0 = vcmp.eq.s32.totalorder %v28_v34, %v23_v62  ;;  %v2930_v11 = vmov 0  ;;  %v231_v22 = vsel %vm223_vm1, %v1793_v48, 0 }
  0x19   :  { %v315_v42 = vsub.f32 %v1785_v40, %v314_v41  ;;  %878 = vmatprep.mubr.f32.mxu0 %v314_v41  ;;  %v1813_v63 = vsel %vm48_vm15, %v58_v33, 0.0  ;;  %v1815_v0 = vsel %vm47_vm0, %v54_v35, 0.0  ;;  %v1960_v27 = vand.u32 4294901760, %v231_v22 }
  0x1a   :  { %143 = vperm.xlu1 %1646, %v92_v14   ;;  %140 = vperm.xlu0 %1645, %v91_v15   ;;  %v2933_v14 = vmov 0  ;;  %v1987_v33 = vand.u32 4294901760, %v1799_v52  ;;  %v2950_v36 = vmov 0  ;;  %v2953_v48 = vmov 0 }
  0x1b   :  { %v316_v43 = vand.u32 4294901760, %v315_v42  ;;  %2945 = vst [vmem:[#allocation15_spill] sm:$0xff] %v1960_v27  ;;  %v2008_v37 = vsub.f32 %v231_v22, %v1960_v27  ;;  %v237_v62 = vsel %vm223_vm1, %v1801_v54, 0  ;;  %v2956_v54 = vmov 0 }
  0x1c   :  { %2949 = vst [vmem:[#allocation19_spill] sm:$0xff] %v1987_v33  ;;  %v2124_v56 = vand.u32 4294901760, %v237_v62 }
  0x1d   :  { %317 = vmatprep.mubr.f32.mxu1 %v316_v43  ;;  %v2853_v49 = vand.u32 4294901760, %v2008_v37 }
  0x1e   :  { %149 = vperm.xlu1 %1646, %v94_v16   ;;  %146 = vperm.xlu0 %1645, %v93_v17   ;;  %v2936_v17 = vmov 0  ;;  %2960 = vst [vmem:[#allocation24_spill] sm:$0xff] %v2124_v56 }
  0x22   :  { %155 = vperm.xlu1 %1646, %v96_v18   ;;  %152 = vperm.xlu0 %1645, %v95_v19   ;;  %v228_v18 = vsel %vm223_vm1, %v1789_v45, 0  ;;  %v2035_v45 = vsub.f32 %v1799_v52, %v1987_v33 }
  0x23   :  { %v1943_v23 = vand.u32 4294901760, %v228_v18 }
  0x25   :  { %2940 = vst [vmem:[#allocation12_spill] sm:$0xff] %v1943_v23  ;;  %v1991_v34 = vsub.f32 %v228_v18, %v1943_v23 }
  0x26   :  { %161 = vperm.xlu1 %1646, %v98_v20   ;;  %158 = vperm.xlu0 %1645, %v97_v21   ;;  %v1934_v21 = vand.u32 4294901760, %v1782_v39 }
  0x27   :  { %v2851_v46 = vand.u32 4294901760, %v1991_v34 }
  0x28   :  { %2939 = vst [vmem:[#allocation11_spill] sm:$0xff] %v1934_v21  ;;  %v1975_v30 = vsub.f32 %v1782_v39, %v1934_v21 }
  0x29   :  { %v2080_v18 = vsub.f32 %v1991_v34, %v2851_v46  ;;  %v2107_v46 = vand.u32 4294901760, %v1803_v55 }
  0x2a   :  { %167 = vperm.xlu1 %1646, %v100_v24   ;;  %164 = vperm.xlu0 %1645, %v99_v25   ;;  %v1946_v24 = vand.u32 4294901760, %v1791_v47  ;;  %v234_v25 = vsel %vm223_vm1, %v1797_v51, 0  ;;  %2946 = vst [vmem:[#allocation16_spill] sm:$0xff] %v1975_v30  ;;  %v2848_v42 = vand.u32 4294901760, %v1975_v30 }
  0x2b   :  { %2959 = vst [vmem:[#allocation23_spill] sm:$0xff] %v2107_v46 }
  0x2c   :  { %2941 = vst [vmem:[#allocation13_spill] sm:$0xff] %v1946_v24  ;;  %v1995_v35 = vsub.f32 %v1791_v47, %v1946_v24  ;;  %v2065_v52 = vsub.f32 %v1975_v30, %v2848_v42 }
  0x2e   :  { %173 = vperm.xlu1 %1646, %v102_v31   ;;  %170 = vperm.xlu0 %1645, %v101_v32   ;;  %v1982_v31 = vand.u32 4294901760, %v1795_v50  ;;  %v1984_v32 = vand.u32 4294901760, %v234_v25  ;;  %v2850_v47 = vand.u32 4294901760, %v1995_v35 }
  0x30   :  { %2947 = vst [vmem:[#allocation17_spill] sm:$0xff] %v1982_v31  ;;  %2948 = vst [vmem:[#allocation18_spill] sm:$0xff] %v1984_v32  ;;  %v2028_v43 = vsub.f32 %v1795_v50, %v1982_v31  ;;  %v2031_v44 = vsub.f32 %v234_v25, %v1984_v32  ;;  %v2085_v22 = vsub.f32 %v1995_v35, %v2850_v47  ;;  %v2854_v25 = vmov 0.0  }
  0x31   :  { %v2104_v47 = vsub.f32 %v2008_v37, %v2853_v49 }
  0x32   :  { %v2865_v53 = vand.u32 4294901760, %v2028_v43  ;;  %v2961_v40 = vand.u32 4294901760, %v2031_v44 }
  0x81   :  { %v1817_v1 = vpop.permute.xlu1 %110  ;;  %v1819_v2 = vpop.permute.xlu0 %104 }
  0x82   :  { %vm175_vm3 = vcmp.eq.s32.totalorder %v1819_v2, %v1822_v3  ;;  %vm177_vm6 = vcmp.eq.s32.totalorder %v1817_v1, %v1822_v3  ;;  %v243_v1 = vsel %vm223_vm1, %v1809_v60, 0 }
  0x85   :  { %v1824_v4 = vpop.permute.xlu1 %113  ;;  %v1826_v5 = vpop.permute.xlu0 %107 }
  0x86   :  { %vm176_vm2 = vcmp.eq.s32.totalorder %v1826_v5, %v1822_v3  ;;  %vm178_vm5 = vcmp.eq.s32.totalorder %v1824_v4, %v1822_v3  ;;  %v199_v5 = vsel %vm175_vm3, 1.0, %v2854_v25 }
  0x87   :  { %vm1838_vm4 = vmpackc.low %vm176_vm2, %vm175_vm3  ;;  %v200_v42 = vsel %vm176_vm2, 1.0, %v2854_v25  ;;  %v2134_v25 = vsub.f32 %v2028_v43, %v2865_v53  ;;  %v2968_v53 = vmov 1.0|1.0  }
  0x88   :  { %v2928_v6 = vsel %vm1838_vm4, 4294967295, %v2927_v6  ;;  %1352 = vmatpush1.bf16.msk.msra.mxu1 %vm1838_vm4, %v2860_v8  ;;  %1460 = vmatpush1.bf16.msk.msra.mxu0 %vm1838_vm4, %v2860_v8  ;;  %vm1864_vm7 = vmpackc.low %vm178_vm5, %vm177_vm6 }
  0x89   :  { %2929 = vst [vmem:[#allocation7_spill] sm:$0xff] %v2928_v6  ;;  %v1850_v9 = vpop.permute.xlu1 %119  ;;  %v1852_v10 = vpop.permute.xlu0 %116  ;;  %1353 = vmatprep.subr.bf16.mxu1 %v2862_v7  ;;  %1461 = vmatprep.subr.bf16.mxu0 %v2862_v7  ;;  %v2931_v11 = vsel %vm1864_vm7, 4294967295, %v2930_v11 }
  0x8a   :  { %2932 = vst [vmem:[#allocation8_spill] sm:$0xff] %v2931_v11  ;;  %vm2847_vm8 = vcmp.eq.s32.totalorder %v1850_v9, %v1822_v3  ;;  %vm2844_vm9 = vcmp.eq.s32.totalorder %v1852_v10, %v1822_v3 }
  0x8b   :  { %vm1890_vm10 = vmpackc.low %vm2847_vm8, %vm2844_vm9 }
  0x8c   :  { %1355 = vmatpush1.bf16.msk.msra.mxu1 %vm1864_vm7, %v2860_v8  ;;  %1463 = vmatpush1.bf16.msk.msra.mxu0 %vm1864_vm7, %v2860_v8  ;;  %v2934_v14 = vsel %vm1890_vm10, 4294967295, %v2933_v14 }
  0x8d   :  { %v1878_v12 = vpop.permute.xlu1 %125  ;;  %v1880_v13 = vpop.permute.xlu0 %122  ;;  %1356 = vmatprep.subr.bf16.mxu1 %v2862_v7  ;;  %1464 = vmatprep.subr.bf16.mxu0 %v2862_v7  ;;  %2935 = vst [vmem:[#allocation9_spill] sm:$0xff] %v2934_v14 }
  0x8e   :  { %vm2841_vm11 = vcmp.eq.s32.totalorder %v1878_v12, %v1822_v3  ;;  %vm2840_vm12 = vcmp.eq.s32.totalorder %v1880_v13, %v1822_v3 }
  0x8f   :  { %vm1916_vm13 = vmpackc.low %vm2841_vm11, %vm2840_vm12 }
  0x90   :  { %1358 = vmatpush1.bf16.msk.msra.mxu1 %vm1890_vm10, %v2860_v8  ;;  %1466 = vmatpush1.bf16.msk.msra.mxu0 %vm1890_vm10, %v2860_v8  ;;  %v2937_v17 = vsel %vm1916_vm13, 4294967295, %v2936_v17 }
  0x91   :  { %v1901_v15 = vpop.permute.xlu1 %131  ;;  %v1903_v16 = vpop.permute.xlu0 %128  ;;  %1359 = vmatprep.subr.bf16.mxu1 %v2862_v7  ;;  %1467 = vmatprep.subr.bf16.mxu0 %v2862_v7  ;;  %2938 = vst [vmem:[#allocation10_spill] sm:$0xff] %v2937_v17 }
  0x92   :  { %vm2843_vm14 = vcmp.eq.s32.totalorder %v1901_v15, %v1822_v3  ;;  %vm2842_vm15 = vcmp.eq.s32.totalorder %v1903_v16, %v1822_v3 }
  0x93   :  { %vm1956_vm0 = vmpackc.low %vm2843_vm14, %vm2842_vm15 }
  0x94   :  { %1361 = vmatpush1.bf16.msk.msra.mxu1 %vm1916_vm13, %v2860_v8  ;;  %1469 = vmatpush1.bf16.msk.msra.mxu0 %vm1916_vm13, %v2860_v8  ;;  %v2943_v26 = vsel %vm1956_vm0, 4294967295, %v2942_v26 }
  0x95   :  { %v1929_v19 = vpop.permute.xlu1 %137  ;;  %v1931_v20 = vpop.permute.xlu0 %134  ;;  %1362 = vmatprep.subr.bf16.mxu1 %v2862_v7  ;;  %1470 = vmatprep.subr.bf16.mxu0 %v2862_v7  ;;  %2944 = vst [vmem:[#allocation14_spill] sm:$0xff] %v2943_v26 }
  0x96   :  { %vm2846_vm12 = vcmp.eq.s32.totalorder %v1929_v19, %v1822_v3  ;;  %vm2845_vm11 = vcmp.eq.s32.totalorder %v1931_v20, %v1822_v3 }
  0x97   :  { %vm2003_vm15 = vmpackc.low %vm2846_vm12, %vm2845_vm11 }
  0x98   :  { %1364 = vmatpush1.bf16.msk.msra.mxu1 %vm1956_vm0, %v2860_v8  ;;  %1472 = vmatpush1.bf16.msk.msra.mxu0 %vm1956_vm0, %v2860_v8  ;;  %v2951_v36 = vsel %vm2003_vm15, 4294967295, %v2950_v36 }
  0x99   :  { %v1969_v28 = vpop.permute.xlu1 %143  ;;  %v1971_v29 = vpop.permute.xlu0 %140  ;;  %1365 = vmatprep.subr.bf16.mxu1 %v2862_v7  ;;  %1473 = vmatprep.subr.bf16.mxu0 %v2862_v7  ;;  %2952 = vst [vmem:[#allocation20_spill] sm:$0xff] %v2951_v36  ;;  %v2962_v36 = vand.u32 4294901760, %v2035_v45 }
  0x9a   :  { %vm2880_vm14 = vcmp.eq.s32.totalorder %v1969_v28, %v1822_v3  ;;  %vm2849_vm9 = vcmp.eq.s32.totalorder %v1971_v29, %v1822_v3 }
  0x9b   :  { %vm2046_vm11 = vmpackc.low %vm2880_vm14, %vm2849_vm9  ;;  %v2144_v26 = vsub.f32 %v2035_v45, %v2962_v36  ;;  %v2965_v36 = vmov 0 }
  0x9c   :  { %1367 = vmatpush1.bf16.msk.msra.mxu1 %vm2003_vm15, %v2860_v8  ;;  %1475 = vmatpush1.bf16.msk.msra.mxu0 %vm2003_vm15, %v2860_v8  ;;  %v2954_v48 = vsel %vm2046_vm11, 4294967295, %v2953_v48 }
  0x9d   :  { %v2017_v39 = vpop.permute.xlu1 %149  ;;  %v2019_v41 = vpop.permute.xlu0 %146  ;;  %1368 = vmatprep.subr.bf16.mxu1 %v2862_v7  ;;  %1476 = vmatprep.subr.bf16.mxu0 %v2862_v7  ;;  %2955 = vst [vmem:[#allocation21_spill] sm:$0xff] %v2954_v48  ;;  %v2139_v48 = vsub.f32 %v2031_v44, %v2961_v40  ;;  %v2155_v40 = vsub.f32 %v199_v5, %v199_v5  ;;  %v240_v5 = vsel %vm223_vm1, %v1805_v58, 0 }
  0x9e   :  { %vm2879_vm12 = vcmp.eq.s32.totalorder %v2017_v39, %v1822_v3  ;;  %vm2852_vm8 = vcmp.eq.s32.totalorder %v2019_v41, %v1822_v3  ;;  %v2190_v58 = vsub.f32 %v237_v62, %v2124_v56 }
  0x9f   :  { %vm2097_vm9 = vmpackc.low %vm2879_vm12, %vm2852_vm8  ;;  %v2983_v11 = vand.u32 4294901760, %v2155_v40 }
  0xa0   :  { %1370 = vmatpush1.bf16.msk.msra.mxu1 %vm2046_vm11, %v2860_v8  ;;  %1478 = vmatpush1.bf16.msk.msra.mxu0 %vm2046_vm11, %v2860_v8  ;;  %v2957_v54 = vsel %vm2097_vm9, 4294967295, %v2956_v54 }
  0xa1   :  { %v2058_v50 = vpop.permute.xlu1 %155  ;;  %v2060_v51 = vpop.permute.xlu0 %152  ;;  %1371 = vmatprep.subr.bf16.mxu1 %v2862_v7  ;;  %1479 = vmatprep.subr.bf16.mxu0 %v2862_v7  ;;  %2958 = vst [vmem:[#allocation22_spill] sm:$0xff] %v2957_v54  ;;  %v2964_v54 = vmov 0.0|0.0   ;;  %v436_v24 = vsub.f32 %v2155_v40, %v2983_v11 }
  0xa2   :  { %vm2878_vm2 = vcmp.eq.s32.totalorder %v2058_v50, %v1822_v3  ;;  %vm2867_vm8 = vcmp.eq.s32.totalorder %v2060_v51, %v1822_v3 }
  0xa3   :  { %vm2163_vm3 = vmpackc.low %vm2878_vm2, %vm2867_vm8  ;;  %vm2974_vm2 = vcmp.eq.s32.totalorder %v1852_v10, %v1822_v3  ;;  %v437_v38 = vand.u32 4294901760, %v436_v24 }
  0xa4   :  { %1373 = vmatpush1.bf16.msk.msra.mxu1 %vm2097_vm9, %v2860_v8  ;;  %1481 = vmatpush1.bf16.msk.msra.mxu0 %vm2097_vm9, %v2860_v8  ;;  %v2963_v8 = vmov 0.0   ;;  %v2966_v36 = vsel %vm2163_vm3, 4294967295, %v2965_v36 }
  0xa5   :  { %v2120_v49 = vpop.permute.xlu1 %161  ;;  %v2122_v57 = vpop.permute.xlu0 %158  ;;  %1374 = vmatprep.subr.bf16.mxu1 %v2862_v7  ;;  %v202_v2 = vsel %vm178_vm5, 1.0, %v2963_v8  ;;  %v2150_v7 = vsub.f32 %v200_v42, %v200_v42  ;;  %1482 = vmatprep.subr.bf16.mxu0 %v2964_v54  ;;  %2967 = vst [vmem:[#allocation25_spill] sm:$0xff] %v2966_v36  ;;  %v2170_v42 = vsub.f32 %v1803_v55, %v2107_v46  ;;  %v201_v17 = vsel %vm177_vm6, 1.0, %v2963_v8 }
  0xa6   :  { %vm2890_vm5 = vcmp.eq.s32.totalorder %v2120_v49, %v1822_v3  ;;  %vm2881_vm8 = vcmp.eq.s32.totalorder %v2122_v57, %v1822_v3  ;;  %v2192_v46 = vsub.f32 %v202_v2, %v202_v2  ;;  %vm2971_vm6 = vcmp.eq.s32.totalorder %v1850_v9, %v1822_v3 }
  0xa7   :  { %v204_v62 = vsel %vm2971_vm6, 1.0, %v2963_v8  ;;  %v2207_v2 = vand.u32 4294901760, %v240_v5  ;;  %v2210_v36 = vand.u32 4294901760, %v1807_v59  ;;  %v2212_v56 = vsub.f32 %v201_v17, %v201_v17  ;;  %vm2225_vm6 = vmpackc.low %vm2890_vm5, %vm2881_vm8 }
  0xa8   :  { %1376 = vmatpush1.bf16.msk.msra.mxu1 %vm2163_vm3, %v2968_v53  ;;  %1484 = vmatpush1.bf16.msk.msra.mxu0 %vm2163_vm3, %v2968_v53  ;;  %v203_v32 = vsel %vm2974_vm2, 1.0, %v2963_v8  ;;  %v2975_v9 = vmov 0  ;;  %v2241_v14 = vsub.f32 %v204_v62, %v204_v62  ;;  %vm2978_vm2 = vcmp.eq.s32.totalorder %v1878_v12, %v1822_v3 }
  0xa9   :  { %v2185_v55 = vpop.permute.xlu1 %167  ;;  %v2187_v4 = vpop.permute.xlu0 %164  ;;  %1377 = vmatprep.subr.bf16.mxu1 %v2964_v54  ;;  %1485 = vmatprep.subr.bf16.mxu0 %v2964_v54  ;;  %2972 = vst [vmem:[#allocation28_spill] sm:$0xff] %v2207_v2  ;;  %2973 = vst [vmem:[#allocation29_spill] sm:$0xff] %v2210_v36  ;;  %v2976_v9 = vsel %vm2225_vm6, 4294967295, %v2975_v9  ;;  %v206_v17 = vsel %vm2978_vm2, 1.0, %v2963_v8  ;;  %vm2979_vm8 = vcmp.eq.s32.totalorder %v1880_v13, %v1822_v3  ;;  %v2982_v62 = vand.u32 4294901760, %v2150_v7 }
  0xaa   :  { %2969 = vst [vmem:[#allocation26_spill] sm:$0xff] %v2185_v55  ;;  %2970 = vst [vmem:[#allocation27_spill] sm:$0xff] %v2187_v4  ;;  %vm2896_vm12 = vcmp.eq.s32.totalorder %v2185_v55, %v1822_v3  ;;  %vm2895_vm14 = vcmp.eq.s32.totalorder %v2187_v4, %v1822_v3  ;;  %v205_v31 = vsel %vm2979_vm8, 1.0, %v2963_v8  ;;  %v2262_v33 = vsub.f32 %v203_v32, %v203_v32 }
  0xab   :  { %2977 = vst [vmem:[#allocation30_spill] sm:$0xff] %v2976_v9  ;;  %v442_v12 = vsub.f32 %v2150_v7, %v2982_v62  ;;  %v2266_v13 = vsub.f32 %v240_v5, %v2207_v2  ;;  %v2270_v9 = vsub.f32 %v1807_v59, %v2210_v36  ;;  %vm2282_vm8 = vmpackc.low %vm2896_vm12, %vm2895_vm14  ;;  %v2984_v32 = vmov 0 }
  0xac   :  { %1379 = vmatpush1.bf16.msk.msra.mxu1 %vm2225_vm6, %v2968_v53  ;;  %1487 = vmatpush1.bf16.msk.msra.mxu0 %vm2225_vm6, %v2968_v53  ;;  %v2985_v32 = vsel %vm2282_vm8, 4294967295, %v2984_v32  ;;  %v2286_v5 = vand.u32 4294901760, %v243_v1  ;;  %v2289_v59 = vand.u32 4294901760, %v1811_v61  ;;  %v2291_v62 = vsub.f32 %v206_v17, %v206_v17 }
  0xad   :  { %v2254_v10 = vpop.permute.xlu1 %173  ;;  %v2256_v60 = vpop.permute.xlu0 %170  ;;  %1380 = vmatprep.subr.bf16.mxu1 %v2964_v54  ;;  %1488 = vmatprep.subr.bf16.mxu0 %v2964_v54  ;;  %2986 = vst [vmem:[#allocation33_spill] sm:$0xff] %v2985_v32  ;;  %v2293_v27 = vsub.f32 %v205_v31, %v205_v31  ;;  %v2989_v11 = vand.u32 4294901760, %v2192_v46  ;;  %vm2990_vm14 = vcmp.eq.s32.totalorder %v1901_v15, %v1822_v3  ;;  %v443_v23 = vand.u32 4294901760, %v442_v12 }
  0xae   :  { %2980 = vst [vmem:[#allocation31_spill] sm:$0xff] %v2254_v10  ;;  %2981 = vst [vmem:[#allocation32_spill] sm:$0xff] %v2256_v60  ;;  %vm198_vm2 = vcmp.eq.s32.totalorder %v2254_v10, %v1822_v3  ;;  %vm2909_vm5 = vcmp.eq.s32.totalorder %v2256_v60, %v1822_v3  ;;  %v208_v31 = vsel %vm2990_vm14, 1.0, %v2963_v8  ;;  %vm2991_vm12 = vcmp.eq.s32.totalorder %v1903_v16, %v1822_v3 }
  0xaf   :  { %2987 = vst [vmem:[#allocation34_spill] sm:$0xff] %v2286_v5  ;;  %2988 = vst [vmem:[#allocation35_spill] sm:$0xff] %v2289_v59  ;;  %v454_v36 = vsub.f32 %v2192_v46, %v2989_v11  ;;  %v207_v17 = vsel %vm2991_vm12, 1.0, %v2963_v8  ;;  %v2992_v2 = vand.u32 4294901760, %v2190_v58  ;;  %v2993_v6 = vand.u32 4294901760, %v2170_v42 }
  0xb0   :  { %1382 = vmatpush1.bf16.msk.msra.mxu1 %vm2282_vm8, %v2968_v53  ;;  %1490 = vmatpush1.bf16.msk.msra.mxu0 %vm2282_vm8, %v2968_v53  ;;  %v2994_v32 = vand.u32 4294901760, %v2212_v56  ;;  %vm2339_vm12 = vmpackc.low %vm198_vm2, %vm2909_vm5  ;;  %v2995_v12 = vmov 0  ;;  %v2349_v24 = vsub.f32 %v207_v17, %v207_v17  ;;  %v2998_v10 = vand.u32 4294901760, %v2241_v14 }
  0xb1   :  { %1383 = vmatprep.subr.bf16.mxu1 %v2964_v54  ;;  %1491 = vmatprep.subr.bf16.mxu0 %v2964_v54  ;;  %v2323_v15 = vsub.f32 %v2190_v58, %v2992_v2  ;;  %v2328_v16 = vsub.f32 %v2170_v42, %v2993_v6  ;;  %v2996_v12 = vsel %vm2339_vm12, 4294967295, %v2995_v12  ;;  %v455_v60 = vand.u32 4294901760, %v454_v36 }
  0xb2   :  { %v448_v21 = vsub.f32 %v2212_v56, %v2994_v32  ;;  %2997 = vst [vmem:[#allocation36_spill] sm:$0xff] %v2996_v12  ;;  %v2347_v32 = vsub.f32 %v208_v31, %v208_v31  ;;  %v466_v55 = vsub.f32 %v2241_v14, %v2998_v10  ;;  %v2362_v31 = vsub.f32 %v243_v1, %v2286_v5 }
  0xb3   :  { %v2366_v17 = vsub.f32 %v1811_v61, %v2289_v59  ;;  %v2999_v2 = vand.u32 4294901760, %v2262_v33  ;;  %vm3000_vm14 = vcmp.eq.s32.totalorder %v1929_v19, %v1822_v3  ;;  %vm3001_vm5 = vcmp.eq.s32.totalorder %v1931_v20, %v1822_v3 }
  0xb4   :  { %1385 = vmatpush1.bf16.msk.msra.mxu1 %vm2339_vm12, %v2968_v53  ;;  %1493 = vmatpush1.bf16.msk.msra.mxu0 %vm2339_vm12, %v2968_v53  ;;  %v210_v10 = vsel %vm3000_vm14, 1.0, %v2963_v8  ;;  %v209_v4 = vsel %vm3001_vm5, 1.0, %v2963_v8  ;;  %v1387_v1 = vpack.c.bf16 %v443_v23, %v437_v38  ;;  %v449_v11 = vand.u32 4294901760, %v448_v21 }
  0xb5   :  { %1386 = vmatprep.subr.bf16.mxu1 %v2964_v54  ;;  %v460_v36 = vsub.f32 %v2262_v33, %v2999_v2  ;;  %1494 = vmatprep.subr.bf16.mxu0 %v2964_v54  ;;  %v3002_v61 = vand.u32 4294901760, %v2065_v52  ;;  %v3003_v6 = vand.u32 4294901760, %v2155_v40  ;;  %v3004_v2 = vand.u32 4294901760, %v2150_v7 }
  0xb6   :  { %v3005_v19 = vand.u32 4294901760, %v2270_v9  ;;  %v246_v20 = vsel %vm223_vm1, %v1813_v63, 0  ;;  %v3006_v5 = vand.u32 4294901760, %v2291_v62  ;;  %v3007_v21 = vand.u32 4294901760, %v2293_v27 }
  0xb7   :  { %323 = vmatmul.mubr.f32.vlgmr.msra.gmra.mrb[0].mxu1 %v3002_v61  ;;  %v1495_v12 = vpack.c.bf16 %v3004_v2, %v3003_v6  ;;  %v3008_v61 = vand.u32 4294901760, %v1975_v30  ;;  %v2403_v2 = vsub.f32 %v210_v10, %v210_v10  ;;  %v467_v52 = vand.u32 4294901760, %v466_v55 }
  0xb8   :  { %v2389_v59 = vsub.f32 %v2270_v9, %v3005_v19  ;;  %v478_v38 = vsub.f32 %v2291_v62, %v3006_v5  ;;  %v472_v23 = vsub.f32 %v2293_v27, %v3007_v21  ;;  %1388 = vmatpush1.bf16.msra.mxu1 %v1387_v1  ;;  %v2405_v19 = vsub.f32 %v209_v4, %v209_v4 }
  0xb9   :  { %882 = vmatmul.mubr.f32.vlgmr.msra.gmra.mrb[0].mxu0 %v3008_v61  ;;  %1389 = vmatprep.subr.bf16.mxu1 %v2964_v54  ;;  %v3009_v5 = vand.u32 4294901760, %v2266_v13  ;;  %v461_v6 = vand.u32 4294901760, %v460_v36  ;;  %v1390_v1 = vpack.c.bf16 %v455_v60, %v449_v11  ;;  %v3010_v10 = vand.u32 4294901760, %v2080_v18 }
  0xba   :  { %1496 = vmatpush1.bf16.msra.mxu0 %v1495_v12  ;;  %vm3011_vm5 = vcmp.eq.s32.totalorder %v1969_v28, %v1822_v3  ;;  %vm3012_vm14 = vcmp.eq.s32.totalorder %v1971_v29, %v1822_v3  ;;  %v3013_v55 = vand.u32 4294901760, %v2212_v56  ;;  %v3014_v36 = vand.u32 4294901760, %v2192_v46 }
  0xbb   :  { %v2412_v21 = vsub.f32 %v2266_v13, %v3009_v5  ;;  %1497 = vmatprep.subr.bf16.mxu0 %v2964_v54  ;;  %332 = vmatprep.mubr.f32.mxu1 %v3010_v10  ;;  %v212_v12 = vsel %vm3011_vm5, 1.0, %v2963_v8  ;;  %v211_v61 = vsel %vm3012_vm14, 1.0, %v2963_v8  ;;  %v3015_v18 = vand.u32 4294901760, %v1991_v34 }
  0xbc   :  { %v1498_v60 = vpack.c.bf16 %v3014_v36, %v3013_v55  ;;  %v3016_v11 = vand.u32 4294901760, %v2085_v22  ;;  %v2434_v5 = vand.u32 4294901760, %v246_v20  ;;  %v479_v28 = vand.u32 4294901760, %v478_v38  ;;  %1391 = vmatpush1.bf16.msra.mxu1 %v1390_v1 }
  0xbd   :  { %889 = vmatprep.mubr.f32.mxu0 %v3015_v18  ;;  %v473_v10 = vand.u32 4294901760, %v472_v23  ;;  %v3017_v63 = vand.u32 4294901760, %v2347_v32  ;;  %v3018_v4 = vand.u32 4294901760, %v2349_v24  ;;  %v3019_v55 = vand.u32 4294901760, %v1995_v35  ;;  %1392 = vmatprep.subr.bf16.mxu1 %v2964_v54 }
  0xbe   :  { %338 = vmatmul.mubr.f32.gmra.mrb[2].mxu1 %v3016_v11  ;;  %v2916_v36 = vand.u32 4294901760, %v2403_v2  ;;  %v2917_v22 = vand.u32 4294901760, %v2405_v19  ;;  %vm3020_vm5 = vcmp.eq.s32.totalorder %v2017_v39, %v1822_v3  ;;  %vm3021_vm14 = vcmp.eq.s32.totalorder %v2019_v41, %v1822_v3  ;;  %1499 = vmatpush1.bf16.msra.mxu0 %v1498_v60 }
  0xbf   :  { %v490_v29 = vsub.f32 %v2347_v32, %v3017_v63  ;;  %v484_v30 = vsub.f32 %v2349_v24, %v3018_v4  ;;  %893 = vmatmul.mubr.f32.gmra.mrb[2].mxu0 %v3019_v55  ;;  %v214_v38 = vsel %vm3020_vm5, 1.0, %v2963_v8  ;;  %v213_v23 = vsel %vm3021_vm14, 1.0, %v2963_v8  ;;  %1500 = vmatprep.subr.bf16.mxu0 %v2964_v54 }
  0xc0   :  { %v2455_v63 = vsub.f32 %v212_v12, %v212_v12  ;;  %v2457_v1 = vsub.f32 %v211_v61, %v211_v61  ;;  %v1393_v4 = vpack.c.bf16 %v467_v52, %v461_v6  ;;  %v3022_v18 = vand.u32 4294901760, %v2104_v47 }
  0xc1   :  { %v3023_v11 = vand.u32 4294901760, %v2262_v33  ;;  %v3024_v41 = vand.u32 4294901760, %v2241_v14  ;;  %v3025_v60 = vand.u32 4294901760, %v2008_v37  ;;  %v3026_v12 = vand.u32 4294901760, %v2134_v25 }
  0xc2   :  { %347 = vmatprep.mubr.f32.mxu1 %v3022_v18  ;;  %v3027_v61 = vand.u32 4294901760, %v2362_v31  ;;  %v2477_v47 = vsub.f32 %v246_v20, %v2434_v5  ;;  %v2480_v6 = vand.u32 4294901760, %v1815_v0  ;;  %v491_v18 = vand.u32 4294901760, %v490_v29  ;;  %1394 = vmatpush1.bf16.msra.mxu1 %v1393_v4 }
  0xc3   :  { %v1501_v55 = vpack.c.bf16 %v3024_v41, %v3023_v11  ;;  %900 = vmatprep.mubr.f32.mxu0 %v3025_v60  ;;  %353 = vmatmul.mubr.f32.gmra.mrb[4].mxu1 %v3026_v12  ;;  %v485_v39 = vand.u32 4294901760, %v484_v30  ;;  %v2482_v11 = vsub.f32 %v214_v38, %v214_v38  ;;  %v2484_v41 = vsub.f32 %v213_v23, %v213_v23 }
  0xc4   :  { %v2474_v52 = vsub.f32 %v2362_v31, %v3027_v61  ;;  %v3028_v25 = vand.u32 4294901760, %v2028_v43  ;;  %v502_v60 = vsub.f32 %v2403_v2, %v2916_v36  ;;  %v496_v20 = vsub.f32 %v2405_v19, %v2917_v22  ;;  %1395 = vmatprep.subr.bf16.mxu1 %v2964_v54 }
  0xc5   :  { %1502 = vmatpush1.bf16.msra.mxu0 %v1501_v55  ;;  %v1396_v30 = vpack.c.bf16 %v479_v28, %v473_v10  ;;  %v376_v29 = vand.u32 4294901760, %v2323_v15  ;;  %v2918_v38 = vand.u32 4294901760, %v2455_v63  ;;  %v507_v23 = vand.u32 4294901760, %v2457_v1 }
  0xc6   :  { %904 = vmatmul.mubr.f32.gmra.mrb[4].mxu0 %v3028_v25  ;;  %vm3029_vm5 = vcmp.eq.s32.totalorder %v2058_v50, %v1822_v3  ;;  %vm3030_vm14 = vcmp.eq.s32.totalorder %v2060_v51, %v1822_v3  ;;  %1503 = vmatprep.subr.bf16.mxu0 %v2964_v54  ;;  %v3031_v28 = vand.u32 4294901760, %v2139_v48  ;;  %v3032_v15 = vand.u32 4294901760, %v2293_v27 }
  0xc7   :  { %v216_v4 = vsel %vm3029_vm5, 1.0, %v2963_v8  ;;  %v215_v12 = vsel %vm3030_vm14, 1.0, %v2963_v8  ;;  %v3033_v10 = vand.u32 4294901760, %v2291_v62  ;;  %v3034_v61 = vand.u32 4294901760, %v2031_v44  ;;  %1397 = vmatpush1.bf16.msra.mxu1 %v1396_v30 }
  0xc8   :  { %362 = vmatprep.mubr.f32.mxu1 %v3031_v28  ;;  %v3035_v50 = vand.u32 4294901760, %v2144_v26  ;;  %v391_v25 = vand.u32 4294901760, %v2412_v21  ;;  %v3036_v51 = vand.u32 4294901760, %v2366_v17  ;;  %v2525_v48 = vsub.f32 %v1815_v0, %v2480_v6  ;;  %1398 = vmatprep.subr.bf16.mxu1 %v2964_v54 }
  0xc9   :  { %v1504_v55 = vpack.c.bf16 %v3033_v10, %v3032_v15  ;;  %911 = vmatprep.mubr.f32.mxu0 %v3034_v61  ;;  %v2919_v28 = vand.u32 4294901760, %v2482_v11  ;;  %v2921_v15 = vand.u32 4294901760, %v2484_v41  ;;  %v1399_v10 = vpack.c.bf16 %v491_v18, %v485_v39 }
  0xca   :  { %368 = vmatmul.mubr.f32.gmra.mrb[6].mxu1 %v3035_v50  ;;  %v2521_v36 = vsub.f32 %v2366_v17, %v3036_v51  ;;  %v3037_v26 = vand.u32 4294901760, %v2035_v45  ;;  %v2920_v21 = vand.u32 4294901760, %v2477_v47  ;;  %v503_v61 = vand.u32 4294901760, %v502_v60 }
  0xcb   :  { %v497_v50 = vand.u32 4294901760, %v496_v20  ;;  %v2532_v22 = vsub.f32 %v216_v4, %v216_v4  ;;  %v2534_v51 = vsub.f32 %v215_v12, %v215_v12  ;;  %1505 = vmatpush1.bf16.msra.mxu0 %v1504_v55  ;;  %v514_v0 = vsub.f32 %v2455_v63, %v2918_v38  ;;  %377 = vmatprep.mubr.f32.mxu1 %v376_v29 }
  0xcc   :  { %915 = vmatmul.mubr.f32.gmra.mrb[6].mxu0 %v3037_v26  ;;  %v508_v39 = vsub.f32 %v2457_v1, %v507_v23  ;;  %vm3038_vm5 = vcmp.eq.s32.totalorder %v2120_v49, %v1822_v3  ;;  %vm3039_vm14 = vcmp.eq.s32.totalorder %v2122_v57, %v1822_v3  ;;  %1506 = vmatprep.subr.bf16.mxu0 %v2964_v54  ;;  %v3040_v20 = vand.u32 4294901760, %v2349_v24 }
  0xcd   :  { %v218_v18 = vsel %vm3038_vm5, 1.0, %v2963_v8  ;;  %v217_v60 = vsel %vm3039_vm14, 1.0, %v2963_v8  ;;  %v3041_v30 = vand.u32 4294901760, %v2347_v32  ;;  %v3042_v12 = vand.u32 4294901760, %v2190_v58  ;;  %1400 = vmatpush1.bf16.msra.mxu1 %v1399_v10 }
  0xce   :  { %v3043_v55 = vand.u32 4294901760, %v2328_v16  ;;  %v397_v49 = vand.u32 4294901760, %v2389_v59  ;;  %v2924_v26 = vand.u32 4294901760, %v2525_v48  ;;  %v526_v57 = vsub.f32 %v2482_v11, %v2919_v28  ;;  %1401 = vmatprep.subr.bf16.mxu1 %v2964_v54 }
  0xcf   :  { %v1507_v4 = vpack.c.bf16 %v3041_v30, %v3040_v20  ;;  %922 = vmatprep.mubr.f32.mxu0 %v3042_v12  ;;  %v520_v29 = vsub.f32 %v2484_v41, %v2921_v15  ;;  %v3044_v20 = vand.u32 4294901760, %v2170_v42  ;;  %v406_v30 = vand.u32 4294901760, %v2474_v52  ;;  %v3045_v52 = vld [vmem:[#allocation26_spill] sm:$0xff] }
  0xd0   :  { %383 = vmatmul.mubr.f32.gmra.mrb[8].mxu1 %v3043_v55  ;;  %v412_v16 = vand.u32 4294901760, %v2521_v36  ;;  %v2922_v59 = vand.u32 4294901760, %v2532_v22  ;;  %v2923_v12 = vand.u32 4294901760, %v2534_v51  ;;  %v2574_v55 = vsub.f32 %v218_v18, %v218_v18 }
  0xd1   :  { %926 = vmatmul.mubr.f32.gmra.mrb[8].mxu0 %v3044_v20  ;;  %v2576_v38 = vsub.f32 %v217_v60, %v217_v60  ;;  %v515_v28 = vand.u32 4294901760, %v514_v0  ;;  %v509_v10 = vand.u32 4294901760, %v508_v39  ;;  %v1402_v20 = vpack.c.bf16 %v503_v61, %v497_v50  ;;  %392 = vmatprep.mubr.f32.mxu1 %v391_v25  ;;  %v3047_v60 = vld [vmem:[#allocation27_spill] sm:$0xff] }
  0xd2   :  { %1508 = vmatpush1.bf16.msra.mxu0 %v1507_v4  ;;  %v420_v36 = vsub.f32 %v2477_v47, %v2920_v21  ;;  %vm3046_vm5 = vcmp.eq.s32.totalorder %v3045_v52, %v1822_v3  ;;  %vm3048_vm14 = vcmp.eq.s32.totalorder %v3047_v60, %v1822_v3  ;;  %v3049_v0 = vand.u32 4294901760, %v2405_v19 }
  0xd3   :  { %1509 = vmatprep.subr.bf16.mxu0 %v2964_v54  ;;  %v220_v18 = vsel %vm3046_vm5, 1.0, %v2963_v8  ;;  %v219_v4 = vsel %vm3048_vm14, 1.0, %v2963_v8  ;;  %v3050_v39 = vand.u32 4294901760, %v2403_v2  ;;  %v3051_v25 = vand.u32 4294901760, %v2266_v13  ;;  %1403 = vmatpush1.bf16.msra.mxu1 %v1402_v20 }
  0xd4   :  { %398 = vmatmul.mubr.f32.gmra.mrb[10].mxu1 %v397_v49  ;;  %v426_v50 = vsub.f32 %v2525_v48, %v2924_v26  ;;  %v527_v52 = vand.u32 4294901760, %v526_v57  ;;  %v521_v21 = vand.u32 4294901760, %v520_v29  ;;  %v3052_v15 = vand.u32 4294901760, %v2270_v9  ;;  %1404 = vmatprep.subr.bf16.mxu1 %v2964_v54 }
  0xd5   :  { %v1510_v61 = vpack.c.bf16 %v3050_v39, %v3049_v0  ;;  %933 = vmatprep.mubr.f32.mxu0 %v3051_v25  ;;  %v538_v60 = vsub.f32 %v2532_v22, %v2922_v59  ;;  %v532_v0 = vsub.f32 %v2534_v51, %v2923_v12  ;;  %v549_v49 = vand.u32 4294901760, %v2574_v55  ;;  %407 = vmatprep.mubr.f32.mxu1 %v406_v30  ;;  %v3054_v12 = vld [vmem:[#allocation32_spill] sm:$0xff] }
  0xd6   :  { %937 = vmatmul.mubr.f32.gmra.mrb[10].mxu0 %v3052_v15  ;;  %v543_v39 = vand.u32 4294901760, %v2576_v38  ;;  %v2611_v57 = vsub.f32 %v220_v18, %v220_v18  ;;  %v2613_v29 = vsub.f32 %v219_v4, %v219_v4  ;;  %v1405_v15 = vpack.c.bf16 %v515_v28, %v509_v10 }
  0xd7   :  { %1511 = vmatpush1.bf16.msra.mxu0 %v1510_v61  ;;  %v421_v20 = vand.u32 4294901760, %v420_v36  ;;  %v222_v59 = vsel %vm198_vm2, 1.0, %v2963_v8  ;;  %vm3055_vm5 = vcmp.eq.s32.totalorder %v3054_v12, %v1822_v3  ;;  %v3056_v18 = vand.u32 4294901760, %v2455_v63 }
  0xd8   :  { %1512 = vmatprep.subr.bf16.mxu0 %v2964_v54  ;;  %v221_v61 = vsel %vm3055_vm5, 1.0, %v2963_v8  ;;  %v3057_v26 = vand.u32 4294901760, %v2362_v31  ;;  %413 = vmatmul.mubr.f32.gmra.mrb[12].mxu1 %v412_v16  ;;  %v427_v28 = vand.u32 4294901760, %v426_v50  ;;  %v1408_v30 = vpack.c.bf16 %v527_v52, %v521_v21 }
  0xd9   :  { %v1513_v4 = vpack.c.bf16 %v3056_v18, %v507_v23  ;;  %1406 = vmatpush1.bf16.msra.mxu1 %v1405_v15  ;;  %v3058_v10 = vand.u32 4294901760, %v2366_v17  ;;  %v539_v36 = vand.u32 4294901760, %v538_v60  ;;  %v533_v25 = vand.u32 4294901760, %v532_v0  ;;  %422 = vmatprep.mubr.f32.mxu1 %v421_v20 }
  0xda   :  { %944 = vmatprep.mubr.f32.mxu0 %v3057_v26  ;;  %v550_v3 = vsub.f32 %v2574_v55, %v549_v49  ;;  %v544_v8 = vsub.f32 %v2576_v38, %v543_v39  ;;  %1407 = vmatprep.subr.bf16.mxu1 %v2964_v54  ;;  %v561_v23 = vand.u32 4294901760, %v2611_v57  ;;  %v555_v26 = vand.u32 4294901760, %v2613_v29 }
  0xdb   :  { %948 = vmatmul.mubr.f32.gmra.mrb[12].mxu0 %v3058_v10  ;;  %v2637_v16 = vsub.f32 %v222_v59, %v222_v59  ;;  %v2639_v12 = vsub.f32 %v221_v61, %v221_v61  ;;  %v3059_v21 = vand.u32 4294901760, %v2484_v41  ;;  %v3060_v50 = vand.u32 4294901760, %v2482_v11 }
  0xdc   :  { %1514 = vmatpush1.bf16.msra.mxu0 %v1513_v4  ;;  %v3061_v60 = vand.u32 4294901760, %v2477_v47  ;;  %428 = vmatmul.mubr.f32.gmra.mrb[14].mxu1 %v427_v28  ;;  %v3062_v0 = vand.u32 4294901760, %v2525_v48  ;;  %v551_v59 = vand.u32 4294901760, %v550_v3  ;;  %v545_v15 = vand.u32 4294901760, %v544_v8  ;;  %v3063_v28 = vld [vmem:[#allocation5_spill] sm:$0xff] }
  0xdd   :  { %1515 = vmatprep.subr.bf16.mxu0 %v2964_v54  ;;  %v1516_v52 = vpack.c.bf16 %v3060_v50, %v3059_v21  ;;  %1409 = vmatpush1.bf16.msra.mxu1 %v1408_v30  ;;  %v1411_v61 = vpack.c.bf16 %v539_v36, %v533_v25  ;;  %v562_v20 = vsub.f32 %v2611_v57, %v561_v23  ;;  %v573_v4 = vand.u32 4294901760, %v2637_v16 }
  0xde   :  { %955 = vmatprep.mubr.f32.mxu0 %v3061_v60  ;;  %1410 = vmatprep.subr.bf16.mxu1 %v2964_v54  ;;  %v556_v18 = vsub.f32 %v2613_v29, %v555_v26  ;;  %v567_v10 = vand.u32 4294901760, %v2639_v12  ;;  %v3064_v30 = vand.u32 4294901760, %v2534_v51  ;;  %v3065_v3 = vand.u32 4294901760, %v2532_v22 }
  0xdf   :  { %959 = vmatmul.mubr.f32.gmra.mrb[14].mxu0 %v3062_v0  ;;  %594 = vmatprep.mubr.f32.mxu1 %v3063_v28  ;;  %v1414_v36 = vpack.c.bf16 %v551_v59, %v545_v15  ;;  %v563_v25 = vand.u32 4294901760, %v562_v20  ;;  %v574_v50 = vsub.f32 %v2637_v16, %v573_v4  ;;  %v1522_v60 = vpack.c.bf16 %v549_v49, %v543_v39  ;;  %v3066_v39 = vld [vmem:[#allocation11_spill] sm:$0xff]  ;;  %v3068_v20 = vld [vmem:[#allocation12_spill] sm:$0xff] }
  0xe0   :  { %1517 = vmatpush1.bf16.msra.mxu0 %v1516_v52  ;;  %v1519_v8 = vpack.c.bf16 %v3065_v3, %v3064_v30  ;;  %1077 = vmatprep.mubr.f32.mxu0 %v3063_v28  ;;  %v557_v21 = vand.u32 4294901760, %v556_v18  ;;  %v568_v52 = vsub.f32 %v2639_v12, %v567_v10  ;;  %v1525_v3 = vpack.c.bf16 %v561_v23, %v555_v26  ;;  %v3072_v18 = vld [vmem:[#allocation17_spill] sm:$0xff] }
  0xe1   :  { %1518 = vmatprep.subr.bf16.mxu0 %v2964_v54  ;;  %1412 = vmatpush1.bf16.msra.mxu1 %v1411_v61  ;;  %v575_v0 = vand.u32 4294901760, %v574_v50  ;;  %v1528_v15 = vpack.c.bf16 %v573_v4, %v567_v10  ;;  %v1423_v49 = vpack.c.bf16 %v2150_v7, %v2155_v40  ;;  %v1426_v26 = vpack.c.bf16 %v2192_v46, %v2212_v56  ;;  %v3069_v7 = vld [vmem:[#allocation13_spill] sm:$0xff]  ;;  %v3071_v56 = vld [vmem:[#allocation15_spill] sm:$0xff] }
  0xe2   :  { %1413 = vmatprep.subr.bf16.mxu1 %v2964_v54  ;;  %v569_v30 = vand.u32 4294901760, %v568_v52  ;;  %v1417_v61 = vpack.c.bf16 %v563_v25, %v557_v21  ;;  %v1429_v46 = vpack.c.bf16 %v2241_v14, %v2262_v33  ;;  %v1432_v14 = vpack.c.bf16 %v2291_v62, %v2293_v27  ;;  %v3074_v33 = vld [vmem:[#allocation18_spill] sm:$0xff]  ;;  %v3075_v10 = vld [vmem:[#allocation19_spill] sm:$0xff]  ;;  %v3077_v62 = vld [vmem:[#allocation24_spill] sm:$0xff] }
  0xe3   :  { %v1435_v27 = vpack.c.bf16 %v2347_v32, %v2349_v24  ;;  %v1438_v32 = vpack.c.bf16 %v2403_v2, %v2405_v19  ;;  %v3080_v24 = vld [vmem:[#allocation28_spill] sm:$0xff]  ;;  %v3081_v21 = vld [vmem:[#allocation29_spill] sm:$0xff]  ;;  %v1441_v2 = vpack.c.bf16 %v2455_v63, %v2457_v1  ;;  %v3083_v19 = vld [vmem:[#allocation34_spill] sm:$0xff]  ;;  %v1444_v63 = vpack.c.bf16 %v2482_v11, %v2484_v41 }
  0xe4   :  { %1520 = vmatpush1.bf16.msra.mxu0 %v1519_v8  ;;  %v1420_v59 = vpack.c.bf16 %v575_v0, %v569_v30  ;;  %v3084_v52 = vld [vmem:[#allocation35_spill] sm:$0xff]  ;;  %v1447_v11 = vpack.c.bf16 %v2532_v22, %v2534_v51  ;;  %v3087_v41 = vld [vmem:[#allocation6_spill] sm:$0xff]  ;;  %v1450_v30 = vpack.c.bf16 %v2574_v55, %v2576_v38  ;;  %v1453_v51 = vpack.c.bf16 %v2611_v57, %v2613_v29  ;;  %v3092_v57 = vld [vmem:[#allocation16_spill] sm:$0xff] }
  0xe5   :  { %1521 = vmatprep.subr.bf16.mxu0 %v2964_v54  ;;  %1415 = vmatpush1.bf16.msra.mxu1 %v1414_v36  ;;  %v3078_v36 = vld [vmem:[#allocation23_spill] sm:$0xff]  ;;  %v1456_v38 = vpack.c.bf16 %v2637_v16, %v2639_v12 }
  0xe6   :  { %1416 = vmatprep.subr.bf16.mxu1 %v2964_v54 }
  0xe8   :  { %1523 = vmatpush1.bf16.msra.mxu0 %v1522_v60 }
  0xe9   :  { %1524 = vmatprep.subr.bf16.mxu0 %v2964_v54  ;;  %1418 = vmatpush1.bf16.msra.mxu1 %v1417_v61 }
  0xea   :  { %1419 = vmatprep.subr.bf16.mxu1 %v2964_v54 }
  0xec   :  { %1526 = vmatpush1.bf16.msra.mxu0 %v1525_v3 }
  0xed   :  { %1527 = vmatprep.subr.bf16.mxu0 %v2964_v54  ;;  %1421 = vmatpush1.bf16.msra.mxu1 %v1420_v59 }
  0xee   :  { %1422 = vmatprep.subr.bf16.mxu1 %v2964_v54 }
  0xf0   :  { %1529 = vmatpush1.bf16.msra.mxu0 %v1528_v15  ;;  %596 = vmatmul.mubr.f32.vlgmr.msra.gmra.mrb[0].mxu1 %v3066_v39 }
  0xf1   :  { %1530 = vmatprep.subr.bf16.mxu0 %v2964_v54  ;;  %1424 = vmatpush1.bf16.msra.mxu1 %v1423_v49 }
  0xf2   :  { %1425 = vmatprep.subr.bf16.mxu1 %v2964_v54  ;;  %601 = vmatprep.mubr.f32.mxu1 %v3068_v20 }
  0xf3   :  { %1079 = vmatmul.mubr.f32.vlgmr.msra.gmra.mrb[0].mxu0 %v3066_v39 }
  0xf4   :  { %1532 = vmatpush1.bf16.msk.msra.mxu0 %vm1838_vm4, %v2968_v53  ;;  %1084 = vmatprep.mubr.f32.mxu0 %v3068_v20 }
  0xf5   :  { %1533 = vmatprep.subr.bf16.mxu0 %v2964_v54  ;;  %603 = vmatmul.mubr.f32.gmra.mrb[2].mxu1 %v3069_v7 }
  0xf6   :  { %1427 = vmatpush1.bf16.msra.mxu1 %v1426_v26  ;;  %608 = vmatprep.mubr.f32.mxu1 %v3071_v56 }
  0xf7   :  { %1086 = vmatmul.mubr.f32.gmra.mrb[2].mxu0 %v3069_v7  ;;  %1428 = vmatprep.subr.bf16.mxu1 %v2964_v54 }
  0xf8   :  { %1535 = vmatpush1.bf16.msk.msra.mxu0 %vm1864_vm7, %v2968_v53  ;;  %1091 = vmatprep.mubr.f32.mxu0 %v3071_v56 }
  0xf9   :  { %1536 = vmatprep.subr.bf16.mxu0 %v2964_v54  ;;  %610 = vmatmul.mubr.f32.gmra.mrb[4].mxu1 %v3072_v18 }
  0xfa   :  { %1430 = vmatpush1.bf16.msra.mxu1 %v1429_v46  ;;  %615 = vmatprep.mubr.f32.mxu1 %v3074_v33 }
  0xfb   :  { %1093 = vmatmul.mubr.f32.gmra.mrb[4].mxu0 %v3072_v18  ;;  %1431 = vmatprep.subr.bf16.mxu1 %v2964_v54 }
  0xfc   :  { %1538 = vmatpush1.bf16.msk.msra.mxu0 %vm1890_vm10, %v2968_v53  ;;  %1098 = vmatprep.mubr.f32.mxu0 %v3074_v33 }
  0xfd   :  { %1539 = vmatprep.subr.bf16.mxu0 %v2964_v54  ;;  %617 = vmatmul.mubr.f32.gmra.mrb[6].mxu1 %v3075_v10 }
  0xfe   :  { %1433 = vmatpush1.bf16.msra.mxu1 %v1432_v14  ;;  %622 = vmatprep.mubr.f32.mxu1 %v3077_v62 }
  0xff   :  { %1100 = vmatmul.mubr.f32.gmra.mrb[6].mxu0 %v3075_v10  ;;  %1434 = vmatprep.subr.bf16.mxu1 %v2964_v54 }
 0x100   :  { %1541 = vmatpush1.bf16.msk.msra.mxu0 %vm1916_vm13, %v2968_v53  ;;  %1105 = vmatprep.mubr.f32.mxu0 %v3077_v62 }
 0x101   :  { %1542 = vmatprep.subr.bf16.mxu0 %v2964_v54  ;;  %624 = vmatmul.mubr.f32.gmra.mrb[8].mxu1 %v3078_v36 }
 0x102   :  { %1436 = vmatpush1.bf16.msra.mxu1 %v1435_v27  ;;  %629 = vmatprep.mubr.f32.mxu1 %v3080_v24 }
 0x103   :  { %1107 = vmatmul.mubr.f32.gmra.mrb[8].mxu0 %v3078_v36  ;;  %1437 = vmatprep.subr.bf16.mxu1 %v2964_v54 }
 0x104   :  { %1544 = vmatpush1.bf16.msk.msra.mxu0 %vm1956_vm0, %v2968_v53  ;;  %1112 = vmatprep.mubr.f32.mxu0 %v3080_v24 }
 0x105   :  { %1545 = vmatprep.subr.bf16.mxu0 %v2964_v54  ;;  %631 = vmatmul.mubr.f32.gmra.mrb[10].mxu1 %v3081_v21 }
 0x106   :  { %1439 = vmatpush1.bf16.msra.mxu1 %v1438_v32  ;;  %636 = vmatprep.mubr.f32.mxu1 %v3083_v19 }
 0x107   :  { %1114 = vmatmul.mubr.f32.gmra.mrb[10].mxu0 %v3081_v21  ;;  %1440 = vmatprep.subr.bf16.mxu1 %v2964_v54 }
 0x108   :  { %1547 = vmatpush1.bf16.msk.msra.mxu0 %vm2003_vm15, %v2968_v53  ;;  %1119 = vmatprep.mubr.f32.mxu0 %v3083_v19 }
 0x109   :  { %1548 = vmatprep.subr.bf16.mxu0 %v2964_v54  ;;  %638 = vmatmul.mubr.f32.gmra.mrb[12].mxu1 %v3084_v52 }
 0x10a   :  { %1442 = vmatpush1.bf16.msra.mxu1 %v1441_v2  ;;  %643 = vmatprep.mubr.f32.mxu1 %v2434_v5 }
 0x10b   :  { %1121 = vmatmul.mubr.f32.gmra.mrb[12].mxu0 %v3084_v52  ;;  %1443 = vmatprep.subr.bf16.mxu1 %v2964_v54 }
 0x10c   :  { %1550 = vmatpush1.bf16.msk.msra.mxu0 %vm2046_vm11, %v2968_v53  ;;  %1126 = vmatprep.mubr.f32.mxu0 %v2434_v5 }
 0x10d   :  { %1551 = vmatprep.subr.bf16.mxu0 %v2964_v54  ;;  %645 = vmatmul.mubr.f32.gmra.mrb[14].mxu1 %v2480_v6 }
 0x10e   :  { %1445 = vmatpush1.bf16.msra.mxu1 %v1444_v63  ;;  %740 = vmatprep.mubr.f32.mxu1 %v3087_v41 }
 0x10f   :  { %1128 = vmatmul.mubr.f32.gmra.mrb[14].mxu0 %v2480_v6  ;;  %1446 = vmatprep.subr.bf16.mxu1 %v2964_v54 }
 0x110   :  { %1553 = vmatpush1.bf16.msk.msra.mxu0 %vm2097_vm9, %v2968_v53  ;;  %1198 = vmatprep.mubr.f32.mxu0 %v3063_v28 }
 0x111   :  { %1554 = vmatprep.subr.bf16.mxu0 %v2964_v54 }
 0x112   :  { %1448 = vmatpush1.bf16.msra.mxu1 %v1447_v11 }
 0x113   :  { %1449 = vmatprep.subr.bf16.mxu1 %v2964_v54 }
 0x114   :  { %1556 = vmatpush1.bf16.msk.msra.mxu0 %vm2163_vm3, %v2968_v53 }
 0x115   :  { %1557 = vmatprep.subr.bf16.mxu0 %v2964_v54 }
 0x116   :  { %1451 = vmatpush1.bf16.msra.mxu1 %v1450_v30 }
 0x117   :  { %1452 = vmatprep.subr.bf16.mxu1 %v2964_v54 }
 0x118   :  { %1559 = vmatpush1.bf16.msk.msra.mxu0 %vm2225_vm6, %v2968_v53 }
 0x119   :  { %1560 = vmatprep.subr.bf16.mxu0 %v2964_v54 }
 0x11a   :  { %1454 = vmatpush1.bf16.msra.mxu1 %v1453_v51 }
 0x11b   :  { %1455 = vmatprep.subr.bf16.mxu1 %v2964_v54 }
 0x11c   :  { %1562 = vmatpush1.bf16.msk.msra.mxu0 %vm2282_vm8, %v2968_v53 }
 0x11d   :  { %1563 = vmatprep.subr.bf16.mxu0 %v2964_v54 }
 0x11e   :  { %1457 = vmatpush1.bf16.msra.mxu1 %v1456_v38 }
 0x120   :  { %1565 = vmatpush1.bf16.msk.msra.mxu0 %vm2339_vm12, %v2968_v53 }
 0x121   :  { %743 = vmatmul.mubr.f32.vlgmr.msra.gmra.mrb[0].mxu1 %v3092_v57 }
 0x122   :  { %749 = vmatprep.mubr.f32.mxu1 %v1991_v34 }
 0x123   :  { %1200 = vmatmul.mubr.f32.vlgmr.msra.gmra.mrb[0].mxu0 %v3066_v39 }
 0x124   :  { %1205 = vmatprep.mubr.f32.mxu0 %v3068_v20 }
 0x125   :  { %752 = vmatmul.mubr.f32.gmra.mrb[2].mxu1 %v1995_v35 }
 0x126   :  { %758 = vmatprep.mubr.f32.mxu1 %v2008_v37 }
 0x127   :  { %1207 = vmatmul.mubr.f32.gmra.mrb[2].mxu0 %v3069_v7 }
 0x128   :  { %1212 = vmatprep.mubr.f32.mxu0 %v3071_v56 }
 0x129   :  { %761 = vmatmul.mubr.f32.gmra.mrb[4].mxu1 %v2028_v43 }
 0x12a   :  { %767 = vmatprep.mubr.f32.mxu1 %v2031_v44 }
 0x12b   :  { %1214 = vmatmul.mubr.f32.gmra.mrb[4].mxu0 %v3072_v18 }
 0x12c   :  { %1219 = vmatprep.mubr.f32.mxu0 %v3074_v33 }
 0x12d   :  { %770 = vmatmul.mubr.f32.gmra.mrb[6].mxu1 %v2035_v45 }
 0x12e   :  { %776 = vmatprep.mubr.f32.mxu1 %v2190_v58 }
 0x12f   :  { %1221 = vmatmul.mubr.f32.gmra.mrb[6].mxu0 %v3075_v10 }
 0x130   :  { %1226 = vmatprep.mubr.f32.mxu0 %v3077_v62 }
 0x131   :  { %779 = vmatmul.mubr.f32.gmra.mrb[8].mxu1 %v2170_v42 }
 0x132   :  { %785 = vmatprep.mubr.f32.mxu1 %v2266_v13 }
 0x133   :  { %1228 = vmatmul.mubr.f32.gmra.mrb[8].mxu0 %v3078_v36 }
 0x134   :  { %1233 = vmatprep.mubr.f32.mxu0 %v3080_v24 }
 0x135   :  { %788 = vmatmul.mubr.f32.gmra.mrb[10].mxu1 %v2270_v9 }
 0x136   :  { %794 = vmatprep.mubr.f32.mxu1 %v2362_v31 }
 0x137   :  { %1235 = vmatmul.mubr.f32.gmra.mrb[10].mxu0 %v3081_v21 }
 0x138   :  { %1240 = vmatprep.mubr.f32.mxu0 %v3083_v19 }
 0x139   :  { %797 = vmatmul.mubr.f32.gmra.mrb[12].mxu1 %v2366_v17 }
 0x13a   :  { %803 = vmatprep.mubr.f32.mxu1 %v2477_v47 }
 0x13b   :  { %1242 = vmatmul.mubr.f32.gmra.mrb[12].mxu0 %v3084_v52 }
 0x13c   :  { %1247 = vmatprep.mubr.f32.mxu0 %v2434_v5 }
 0x13d   :  { %806 = vmatmul.mubr.f32.gmra.mrb[14].mxu1 %v2525_v48 }
 0x13f   :  { %1249 = vmatmul.mubr.f32.gmra.mrb[14].mxu0 %v2480_v6 }
 0x1f4   :  { %v744_v34 = vpop.f32.mrb[0].mxu1 }
 0x1f5   :  { %v746_v37 = vpop.f32.mrb[1].mxu1 }
 0x1f6   :  { %v1201_v35 = vpop.f32.mrb[0].mxu0 }
 0x1f7   :  { %v1566_v43 = vadd.f32 %v1201_v35, %v744_v34  ;;  %v1203_v44 = vpop.f32.mrb[1].mxu0 }
 0x1f8   :  { %v753_v45 = vpop.f32.mrb[2].mxu1 }
 0x1f9   :  { %1254 = vst.msk [vmem:[#allocation2] sm:$0xff] %vm223_vm1, %v1566_v43  ;;  %v755_v54 = vpop.f32.mrb[3].mxu1 }
 0x1fa   :  { %v1208_v53 = vpop.f32.mrb[2].mxu0 }
 0x1fb   :  { %v1567_v42 = vadd.f32 %v1208_v53, %v753_v45  ;;  %v1210_v58 = vpop.f32.mrb[3].mxu0 }
 0x1fc   :  { %v762_v9 = vpop.f32.mrb[4].mxu1 }
 0x1fd   :  { %1255 = vst.msk [vmem:[#allocation2 + $0x8] sm:$0xff] %vm223_vm1, %v1567_v42  ;;  %v764_v31 = vpop.f32.mrb[5].mxu1 }
 0x1fe   :  { %v1215_v13 = vpop.f32.mrb[4].mxu0 }
 0x1ff   :  { %v1568_v17 = vadd.f32 %v1215_v13, %v762_v9  ;;  %v1217_v5 = vpop.f32.mrb[5].mxu0 }
 0x200   :  { %v771_v47 = vpop.f32.mrb[6].mxu1 }
 0x201   :  { %1256 = vst.msk [vmem:[#allocation2 + $0x10] sm:$0xff] %vm223_vm1, %v1568_v17  ;;  %v773_v48 = vpop.f32.mrb[7].mxu1 }
 0x202   :  { %v1222_v6 = vpop.f32.mrb[6].mxu0 }
 0x203   :  { %v1569_v29 = vadd.f32 %v1222_v6, %v771_v47  ;;  %v1224_v16 = vpop.f32.mrb[7].mxu0 }
 0x204   :  { %v780_v12 = vpop.f32.mrb[8].mxu1 }
 0x205   :  { %1257 = vst.msk [vmem:[#allocation2 + $0x18] sm:$0xff] %vm223_vm1, %v1569_v29  ;;  %v782_v3 = vpop.f32.mrb[9].mxu1 }
 0x206   :  { %v1229_v61 = vpop.f32.mrb[8].mxu0 }
 0x207   :  { %v1570_v59 = vadd.f32 %v1229_v61, %v780_v12  ;;  %v1231_v15 = vpop.f32.mrb[9].mxu0 }
 0x208   :  { %v789_v49 = vpop.f32.mrb[10].mxu1 }
 0x209   :  { %1258 = vst.msk [vmem:[#allocation2 + $0x20] sm:$0xff] %vm223_vm1, %v1570_v59  ;;  %v791_v23 = vpop.f32.mrb[11].mxu1 }
 0x20a   :  { %v1236_v39 = vpop.f32.mrb[10].mxu0 }
 0x20b   :  { %v1571_v26 = vadd.f32 %v1236_v39, %v789_v49  ;;  %v1238_v20 = vpop.f32.mrb[11].mxu0 }
 0x20c   :  { %v798_v7 = vpop.f32.mrb[12].mxu1 }
 0x20d   :  { %1259 = vst.msk [vmem:[#allocation2 + $0x28] sm:$0xff] %vm223_vm1, %v1571_v26  ;;  %v800_v46 = vpop.f32.mrb[13].mxu1 }
 0x20e   :  { %v1243_v40 = vpop.f32.mrb[12].mxu0 }
 0x20f   :  { %v1572_v56 = vadd.f32 %v1243_v40, %v798_v7  ;;  %v1245_v18 = vpop.f32.mrb[13].mxu0 }
 0x210   :  { %v807_v4 = vpop.f32.mrb[14].mxu1 }
 0x211   :  { %1260 = vst.msk [vmem:[#allocation2 + $0x30] sm:$0xff] %vm223_vm1, %v1572_v56  ;;  %v809_v33 = vpop.f32.mrb[15].mxu1 }
 0x212   :  { %v1250_v14 = vpop.f32.mrb[14].mxu0 }
 0x213   :  { %v1573_v10 = vadd.f32 %v1250_v14, %v807_v4  ;;  %v1252_v8 = vpop.f32.mrb[15].mxu0 }
 0x215   :  { %1261 = vst.msk [vmem:[#allocation2 + $0x38] sm:$0xff] %vm223_vm1, %v1573_v10 }
 0x216   :  { %1658 = shalt.err (!%p1655_p4)
}
 0x217   :  { %s1659_s12 = scalar_lea.hbm %s2839_s3, 1024 }
 0x218   :  { %p1660_p5 = scmp.ne.s32.totalorder %s2839_s3, %s1659_s12  ;;  %p1663_p6 = scmp.lt.u32.totalorder %s1659_s12, %s2839_s3 }
 0x21a   :  { %p1665_p7 = pnand %p1663_p6, %p1660_p5 }
 0x21c   :  { %1668 = shalt.err (!%p1665_p7)
}
 0x21d   :  { %s1676_s17 = smov 128   ;;  %s1677_s18 = smov 8  }
 0x21e   :  { %1273 = dma.vmem_to_hbm [thread:$0]  %s1268_s1, 1024, %s2839_s3, [#allocation3], %s1676_s17, %s1676_s17, %s1677_s18  }
 0x21f   :  { %1669 = dma.done.wait [#allocation3], 1024  }
 0x220   :  { %1670 = vsyncadd [#allocation3], 4294966272 }
 0x221   :  { %1277 = vsyncpa [#allocation3], 1 }

</bundles_post_ra>
